<compile_context>
chip_gen: v7x
topology: tpu7x:2x2x1
jax: 0.10.0
libtpu: 0.0.40
codegen_flags: <defaults>
</compile_context>

<pallas_src>
import math
from functools import partial

import jax
import jax.numpy as jnp
from jax.experimental import pallas as pl
from jax.experimental.pallas import tpu as pltpu


def _round_up(x: int, m: int) -> int:
    return ((x + m - 1) // m) * m


def _ceil_div(a: int, b: int) -> int:
    return -(-a // b)


def _vmem_budget_bytes() -> int:
    """VMEM budget = physical capacity minus ~24 MiB compiler headroom, capped
    at 64 MiB.  v7x (64 MiB) -> 40 MiB; v5e/v6e (128 MiB) -> 64 MiB."""
    try:
        cap = pltpu.get_tpu_info().vmem_capacity_bytes
    except Exception:  # off-device tracing / API mismatch: conservative default
        cap = 64 * 1024 * 1024
    return int(min(max(cap - 24 * 1024 * 1024, 32 * 1024 * 1024), 64 * 1024 * 1024))


def adapter_kernel(x_ref, w_down_ref, b_down_ref, w_up_ref, b_up_ref, o_ref):
    """Fused adapter: linear -> ReLU -> linear on one row-tile per grid step."""
    # In-kernel bf16 cast: free VPU filler under DMA slack; keeps the wrapper
    # from doing an extra full pad/cast pass over the activations.
    x = x_ref[...].astype(jnp.bfloat16)                        # [TM, C_pad]

    # down_proj: bf16 MXU inputs, f32 accumulation; f32 bias + ReLU.
    h = jnp.dot(x, w_down_ref[...], preferred_element_type=jnp.float32)
    h = jnp.maximum(h + b_down_ref[...], 0.0)                  # [TM, A_pad]

    # up_proj: hidden cast to bf16 only as an MXU input; accumulate in f32.
    out = jnp.dot(h.astype(jnp.bfloat16), w_up_ref[...],
                  preferred_element_type=jnp.float32)
    out = out + b_up_ref[...]

    # Dropout is identity in eval mode.
    # TODO(synk): train-mode dropout would need pltpu.prng_seed/prng_random_bits.
    o_ref[...] = out.astype(o_ref.dtype)


def prepare_adapter_params(w_down, b_down, w_up, b_up):
    """One-time pad + bf16 cast of the adapter weights (hoisted out of the
    per-call jit path).  Weights are [in, out]; biases are 1-D.
    Feature dims are zero-padded to multiples of 128 (lane-dense); the hidden
    dim pads to exactly 128 for small adapters (kernel is HBM-bound, so wider
    MXU fill would only add wasted bytes/FLOPs)."""
    C, A = w_down.shape
    C_pad = _round_up(C, 128)
    A_pad = _round_up(A, 128)
    w_down_p = jnp.pad(w_down, ((0, C_pad - C), (0, A_pad - A))).astype(jnp.bfloat16)
    w_up_p = jnp.pad(w_up, ((0, A_pad - A), (0, C_pad - C))).astype(jnp.bfloat16)
    b_down_p = jnp.pad(b_down.reshape(1, -1).astype(jnp.float32),
                       ((0, 0), (0, A_pad - A)))
    b_up_p = jnp.pad(b_up.reshape(1, -1).astype(jnp.float32),
                     ((0, 0), (0, C_pad - C)))
    return w_down_p, b_down_p, w_up_p, b_up_p


@partial(jax.jit, static_argnames=("block_m",))
def adapter_forward(x, w_down_p, b_down_p, w_up_p, b_up_p, *, block_m=1024):
    """x: [B, T, C]; params come from prepare_adapter_params (padded, bf16)."""
    B, T, C = x.shape
    N = B * T
    C_pad, A_pad = w_down_p.shape
    out_dtype = x.dtype          # emit x.dtype directly -> no post-kernel cast pass
    x_b = x.dtype.itemsize
    o_b = jnp.dtype(out_dtype).itemsize

    x2 = x.reshape(N, C)
    if C_pad != C:               # only the non-128-aligned case pays a pad pass
        x2 = jnp.pad(x2, ((0, 0), (0, C_pad - C)))

    # ---- Tile sizing: largest TM that fits the per-generation VMEM budget ----
    budget = _vmem_budget_bytes()
    per_row = (C_pad * x_b * 2          # x tile, double-buffered
               + C_pad * o_b * 2        # out tile, double-buffered
               + C_pad * 2              # in-kernel bf16 copy of x
               + A_pad * 4              # f32 hidden
               + C_pad * 4)             # f32 accumulator before output cast
    resident = (2 * 2 * (C_pad * A_pad + A_pad * C_pad)  # bf16 weights x2 pipeline bufs
                + 2 * 4 * (A_pad + C_pad)                # f32 biases x2 pipeline bufs
                + 2 * 1024 * 1024)                       # internal scratch headroom
    avail = max(budget - resident, per_row * 16)
    TM = min(block_m, max(16, (avail // per_row) // 16 * 16))  # bf16 packs 16 sublanes
    TM = min(TM, _round_up(N, 16))

    # v7x megacore: "parallel" row axis only shards across both TensorCores
    # with >= 2 grid steps (ideally an even count).
    steps = _ceil_div(N, TM)
    if steps == 1 and TM > 16:
        TM = max(16, _round_up(_ceil_div(N, 2), 16))
    elif steps > 1 and steps % 2 == 1:
        cand = max(16, _round_up(_ceil_div(N, steps + 1), 16))
        if _ceil_div(N, cand) % 2 == 0:
            TM = cand
    steps = _ceil_div(N, TM)     # ragged last block: no garbage-row over-padding

    cost = pl.CostEstimate(
        flops=4 * N * C_pad * A_pad,        # two matmuls, 2*M*K*N each
        transcendentals=0,                  # ReLU has none
        bytes_accessed=(N * C_pad * x_b + N * C_pad * o_b
                        + 2 * 2 * C_pad * A_pad + 4 * (A_pad + C_pad)),
    )

    out_p = pl.pallas_call(
        adapter_kernel,
        out_shape=jax.ShapeDtypeStruct((N, C_pad), out_dtype),
        grid=(steps,),
        in_specs=[
            pl.BlockSpec((TM, C_pad), lambda i: (i, 0)),      # x row tile
            # Constant index maps -> fetched once, VMEM-resident across steps.
            # (pipeline_mode=pl.Buffered(1) would reclaim their second buffer;
            #  kept at the default for portability, and the double buffer is
            #  already accounted for in the TM budget above.)
            pl.BlockSpec((C_pad, A_pad), lambda i: (0, 0)),
            pl.BlockSpec((1, A_pad), lambda i: (0, 0)),
            pl.BlockSpec((A_pad, C_pad), lambda i: (0, 0)),
            pl.BlockSpec((1, C_pad), lambda i: (0, 0)),
        ],
        out_specs=pl.BlockSpec((TM, C_pad), lambda i: (i, 0)),
        compiler_params=pltpu.CompilerParams(
            dimension_semantics=("parallel",),   # megacore sharding on v7x
            vmem_limit_bytes=budget,
        ),
        cost_estimate=cost,
    )(x2, w_down_p, b_down_p, w_up_p, b_up_p)

    if C_pad != C:
        out_p = out_p[:, :C]
    return out_p.reshape(B, T, C)


def init_params(key, n_embd, adapter_size):
    """Deterministic init mirroring nn.Linear's default (uniform +-1/sqrt(fan_in)).
    Weights stored as [in, out] = transpose of PyTorch's [out, in]; biases 1-D."""
    k1, k2, k3, k4 = jax.random.split(key, 4)

    bound_down = 1.0 / math.sqrt(n_embd)
    w_down = jax.random.uniform(k1, (n_embd, adapter_size), jnp.float32,
                                -bound_down, bound_down)
    b_down = jax.random.uniform(k2, (adapter_size,), jnp.float32,
                                -bound_down, bound_down)

    bound_up = 1.0 / math.sqrt(adapter_size)
    w_up = jax.random.uniform(k3, (adapter_size, n_embd), jnp.float32,
                              -bound_up, bound_up)
    b_up = jax.random.uniform(k4, (n_embd,), jnp.float32,
                              -bound_up, bound_up)
    return w_down, b_down, w_up, b_up


if __name__ == "__main__":
    # config = {'n_embd': 32, 'adapter_size': 16, 'dropout': 0.0}
    B, T, n_embd, adapter_size = 2, 8, 32, 16

    key = jax.random.PRNGKey(0)
    k_x, k_p = jax.random.split(key)
    x = jax.random.normal(k_x, (B, T, n_embd), dtype=jnp.float32)
    w_down, b_down, w_up, b_up = init_params(k_p, n_embd, adapter_size)

    # One-time weight preparation (pad + bf16 cast) outside the jitted forward.
    params = prepare_adapter_params(w_down, b_down, w_up, b_up)

    out = adapter_forward(x, *params)
    jax.block_until_ready(out)

    # Reference in plain f32 JAX (eval-mode dropout = identity).  Tolerance is
    # loosened because kernel matmul inputs are bf16 (accumulation stays f32).
    h_ref = jnp.maximum(x.reshape(-1, n_embd) @ w_down + b_down, 0.0)
    out_ref = (h_ref @ w_up + b_up).reshape(B, T, n_embd)
    assert jnp.allclose(out, out_ref, atol=2e-2, rtol=2e-2), \
        float(jnp.max(jnp.abs(out - out_ref)))

    print("KERNEL_OK")
</pallas_src>

<mosaic_0001>
module attributes {stable_mosaic.version = 11 : i64} {
  func.func @adapter_kernel(%arg0: i32, %arg1: memref<16x128xf32, #tpu.memory_space<vmem>>, %arg2: memref<128x128xbf16, #tpu.memory_space<vmem>>, %arg3: memref<1x128xf32, #tpu.memory_space<vmem>>, %arg4: memref<128x128xbf16, #tpu.memory_space<vmem>>, %arg5: memref<1x128xf32, #tpu.memory_space<vmem>>, %arg6: memref<16x128xf32, #tpu.memory_space<vmem>>) attributes {dimension_semantics = [#tpu.dimension_semantics<parallel>], iteration_bounds = array<i64: 1>, scalar_prefetch = 0 : i64, scratch_operands = 0 : i64, tpu.core_type = #tpu.core_type<tc>, window_params = [{transform_indices = @transform_0, window_bounds = array<i64: 16, 128>}, {pipeline_mode = #tpu.pipeline_mode<synchronous>, transform_indices = @transform_1, window_bounds = array<i64: 128, 128>}, {pipeline_mode = #tpu.pipeline_mode<synchronous>, transform_indices = @transform_2, window_bounds = array<i64: 1, 128>}, {pipeline_mode = #tpu.pipeline_mode<synchronous>, transform_indices = @transform_3, window_bounds = array<i64: 128, 128>}, {pipeline_mode = #tpu.pipeline_mode<synchronous>, transform_indices = @transform_4, window_bounds = array<i64: 1, 128>}, {transform_indices = @transform_5, window_bounds = array<i64: 16, 128>}]} {
    %c0 = arith.constant 0 : index
    %c0_0 = arith.constant 0 : index
    %0 = vector.load %arg1[%c0, %c0_0] : memref<16x128xf32, #tpu.memory_space<vmem>>, vector<16x128xf32>
    %1 = arith.truncf %0 : vector<16x128xf32> to vector<16x128xbf16>
    %c0_1 = arith.constant 0 : index
    %c0_2 = arith.constant 0 : index
    %2 = vector.load %arg2[%c0_1, %c0_2] : memref<128x128xbf16, #tpu.memory_space<vmem>>, vector<128x128xbf16>
    %cst = arith.constant dense<0.000000e+00> : vector<16x128xf32>
    %3 = tpu.matmul %1, %2, %cst {dimension_numbers = #tpu.dot_dimension_numbers<[1], [0], [0], [1], [0, 0, 1, 1], [], []>} : vector<16x128xbf16>, vector<128x128xbf16>, vector<16x128xf32> -> vector<16x128xf32>
    %c0_3 = arith.constant 0 : index
    %c0_4 = arith.constant 0 : index
    %4 = vector.load %arg3[%c0_3, %c0_4] : memref<1x128xf32, #tpu.memory_space<vmem>>, vector<1x128xf32>
    %5 = vector.broadcast %4 : vector<1x128xf32> to vector<16x128xf32>
    %6 = arith.addf %3, %5 : vector<16x128xf32>
    %cst_5 = arith.constant 0.000000e+00 : f32
    %7 = vector.broadcast %cst_5 : f32 to vector<16x128xf32>
    %8 = arith.maximumf %6, %7 : vector<16x128xf32>
    %9 = arith.truncf %8 : vector<16x128xf32> to vector<16x128xbf16>
    %c0_6 = arith.constant 0 : index
    %c0_7 = arith.constant 0 : index
    %10 = vector.load %arg4[%c0_6, %c0_7] : memref<128x128xbf16, #tpu.memory_space<vmem>>, vector<128x128xbf16>
    %cst_8 = arith.constant dense<0.000000e+00> : vector<16x128xf32>
    %11 = tpu.matmul %9, %10, %cst_8 {dimension_numbers = #tpu.dot_dimension_numbers<[1], [0], [0], [1], [0, 0, 1, 1], [], []>} : vector<16x128xbf16>, vector<128x128xbf16>, vector<16x128xf32> -> vector<16x128xf32>
    %c0_9 = arith.constant 0 : index
    %c0_10 = arith.constant 0 : index
    %12 = vector.load %arg5[%c0_9, %c0_10] : memref<1x128xf32, #tpu.memory_space<vmem>>, vector<1x128xf32>
    %13 = vector.broadcast %12 : vector<1x128xf32> to vector<16x128xf32>
    %14 = arith.addf %11, %13 : vector<16x128xf32>
    %c0_11 = arith.constant 0 : index
    %c0_12 = arith.constant 0 : index
    %15 = vector.load %arg6[%c0_11, %c0_12] : memref<16x128xf32, #tpu.memory_space<vmem>>, vector<16x128xf32>
    tpu.vector_store %arg6[%c0_11, %c0_12], %14 {strides = array<i32>} : memref<16x128xf32, #tpu.memory_space<vmem>>, vector<16x128xf32>,
    return
  }
  func.func @transform_0(%arg0: i32) -> (i32, i32) {
    %c0_i32 = arith.constant 0 : i32
    %c0_i32_0 = arith.constant 0 : i32
    return %arg0, %c0_i32 : i32, i32
  }
  func.func @transform_1(%arg0: i32) -> (i32, i32) {
    %c0_i32 = arith.constant 0 : i32
    %c0_i32_0 = arith.constant 0 : i32
    %c0_i32_1 = arith.constant 0 : i32
    return %c0_i32, %c0_i32_0 : i32, i32
  }
  func.func @transform_2(%arg0: i32) -> (i32, i32) {
    %c0_i32 = arith.constant 0 : i32
    %c0_i32_0 = arith.constant 0 : i32
    %c0_i32_1 = arith.constant 0 : i32
    return %c0_i32, %c0_i32_0 : i32, i32
  }
  func.func @transform_3(%arg0: i32) -> (i32, i32) {
    %c0_i32 = arith.constant 0 : i32
    %c0_i32_0 = arith.constant 0 : i32
    %c0_i32_1 = arith.constant 0 : i32
    return %c0_i32, %c0_i32_0 : i32, i32
  }
  func.func @transform_4(%arg0: i32) -> (i32, i32) {
    %c0_i32 = arith.constant 0 : i32
    %c0_i32_0 = arith.constant 0 : i32
    %c0_i32_1 = arith.constant 0 : i32
    return %c0_i32, %c0_i32_0 : i32, i32
  }
  func.func @transform_5(%arg0: i32) -> (i32, i32) {
    %c0_i32 = arith.constant 0 : i32
    %c0_i32_0 = arith.constant 0 : i32
    return %arg0, %c0_i32 : i32, i32
  }
}

</mosaic_0001>

<bundles_post_ra>
// kernel: adapter_forward.1
= control target key start
LH: loop header
LB: loop body
LE: loop exit
PB: predicated region body
PF: predicated region fallthrough
CT: control target
= control target key end

     0   :  { %10 = vsyncpa [#allocation3], 0  ;;  %s511_s0 = inlined_call_operand.vmem [shape: f32[16,128], index: 0, kind: input, shape index: {}]   ;;  %s512_s1 = inlined_call_operand.hbm [shape: bf16[128,128], index: 1, kind: input, shape index: {}]   ;;  %s513_s2 = inlined_call_operand.vmem [shape: f32[1,128], index: 2, kind: input, shape index: {}]   ;;  %s514_s3 = inlined_call_operand.hbm [shape: bf16[128,128], index: 3, kind: input, shape index: {}]   ;;  %s515_s4 = inlined_call_operand.vmem [shape: f32[1,128], index: 4, kind: input, shape index: {}]   ;;  %s516_s5 = inlined_call_operand.vmem [shape: f32[16,128], index: 5, kind: output, shape index: {}]  }
   0x1   :  { %11 = vsyncpa [#allocation5], 0  ;;  %s433_s18 = smov [#allocation2]   ;;  %s385_s22 = scalar_lea.hbm %s512_s1, 1024 }
   0x2   :  { %s19_s19 = sshll.u32 %s433_s18, 4  ;;  %p386_p0 = scmp.ne.s32.totalorder %s512_s1, %s385_s22  ;;  %s20_s19 = int_to_ptr.vmem [resolvable:$true] %s19_s19 }
   0x3   :  { %p389_p1 = scmp.lt.u32.totalorder %s385_s22, %s512_s1 }
   0x5   :  { %p391_p2 = pnand %p389_p1, %p386_p0 }
   0x7   :  { %394 = shalt.err (!%p391_p2)
}
   0x8   :  { %s395_s27 = scalar_lea.vmem %s20_s19, 1024  ;;  %p400_p4 = scmp.lt.s32.totalorder %s20_s19, %s20_s19 }
   0x9   :  { %p396_p3 = scmp.ne.s32.totalorder %s20_s19, %s395_s27  ;;  %p401_p5 = scmp.lt.s32.totalorder %s395_s27, %s395_s27 }
   0xb   :  { %p402_p6 = por %p401_p5, %p400_p4 }
   0xd   :  { %p403_p7 = pnand %p402_p6, %p396_p3 }
   0xf   :  { %406 = shalt.err (!%p403_p7)
}
  0x10   :  { %s434_s28 = smov 64   ;;  %s435_s29 = smov 4  }
  0x11   :  { %25 = dma.hbm_to_vmem [thread:$0]  %s512_s1, 1024, %s20_s19, [#allocation3], %s434_s28, %s434_s28, %s435_s29  }
  0x12   :  { %s436_s7 = smov [#allocation4]   ;;  %s407_s11 = scalar_lea.hbm %s514_s3, 1024 }
  0x13   :  { %s33_s8 = sshll.u32 %s436_s7, 4  ;;  %p408_p8 = scmp.ne.s32.totalorder %s514_s3, %s407_s11  ;;  %s34_s8 = int_to_ptr.vmem [resolvable:$true] %s33_s8 }
  0x14   :  { %p411_p9 = scmp.lt.u32.totalorder %s407_s11, %s514_s3 }
  0x16   :  { %p413_p10 = pnand %p411_p9, %p408_p8 }
  0x18   :  { %416 = shalt.err (!%p413_p10)
}
  0x19   :  { %s417_s16 = scalar_lea.vmem %s34_s8, 1024  ;;  %p422_p12 = scmp.lt.s32.totalorder %s34_s8, %s34_s8 }
  0x1a   :  { %p418_p11 = scmp.ne.s32.totalorder %s34_s8, %s417_s16  ;;  %p423_p13 = scmp.lt.s32.totalorder %s417_s16, %s417_s16 }
  0x1c   :  { %p424_p0 = por %p423_p13, %p422_p12 }
  0x1e   :  { %p425_p1 = pnand %p424_p0, %p418_p11 }
  0x20   :  { %428 = shalt.err (!%p425_p1)
}
  0x21   :  { %39 = dma.hbm_to_vmem [thread:$0]  %s514_s3, 1024, %s34_s8, [#allocation5], %s434_s28, %s434_s28, %s435_s29  }
  0x22   :  { %429 = dma.done.wait [#allocation3], 1024  }
  0x23   :  { %430 = vsyncadd [#allocation3], 4294966272 }
  0x24   :  { %431 = dma.done.wait [#allocation5], 1024  }
  0x25   :  { %432 = vsyncadd [#allocation5], 4294966272  ;;  %v437_v0 = vmov 0.0   ;;  %vm438_vm0 = vmmov 0   ;;  %v369_v1 = vld [vmem:[#allocation2] sm:$0xff]   ;;  %v370_v2 = vld [vmem:[#allocation2 + $0x8] sm:$0xff]  }
  0x26   :  { %323 = vmatprep.subr.bf16.mxu0 %v437_v0  ;;  %339 = vmatprep.mubr.msk.bf16.mxu0 %vm438_vm0, %v437_v0  ;;  %v371_v3 = vld [vmem:[#allocation2 + $0x10] sm:$0xff]   ;;  %v377_v4 = vld [vmem:[#allocation4] sm:$0xff]   ;;  %v372_v5 = vld [vmem:[#allocation2 + $0x18] sm:$0xff]  }
  0x27   :  { %343 = vmatprep.subr.bf16.mxu1 %v437_v0  ;;  %359 = vmatprep.mubr.msk.bf16.mxu1 %vm438_vm0, %v437_v0  ;;  %v378_v6 = vld [vmem:[#allocation4 + $0x8] sm:$0xff]   ;;  %v373_v7 = vld [vmem:[#allocation2 + $0x20] sm:$0xff]   ;;  %v379_v8 = vld [vmem:[#allocation4 + $0x10] sm:$0xff]  }
  0x28   :  { %324 = vmatpush3.bf16.msra.mxu0 %v369_v1  ;;  %344 = vmatpush3.bf16.msra.mxu1 %v377_v4  ;;  %v374_v9 = vld [vmem:[#allocation2 + $0x28] sm:$0xff]   ;;  %v380_v10 = vld [vmem:[#allocation4 + $0x18] sm:$0xff]   ;;  %v375_v11 = vld [vmem:[#allocation2 + $0x30] sm:$0xff]  }
  0x29   :  { %325 = vmatprep.subr.bf16.mxu0 %v437_v0  ;;  %345 = vmatprep.subr.bf16.mxu1 %v437_v0  ;;  %v381_v12 = vld [vmem:[#allocation4 + $0x20] sm:$0xff]   ;;  %v376_v13 = vld [vmem:[#allocation2 + $0x38] sm:$0xff]   ;;  %v50_v15 = vld [vmem:[%s511_s0 + $0x8] sm:$0xff] }
  0x2a   :  { %v49_v14 = vld [vmem:[%s511_s0] sm:$0xff]  ;;  %v382_v16 = vld [vmem:[#allocation4 + $0x28] sm:$0xff]   ;;  %v383_v18 = vld [vmem:[#allocation4 + $0x30] sm:$0xff]  }
  0x2b   :  { %v51_v17 = vpack.c.bf16 %v50_v15, %v49_v14  ;;  %v384_v19 = vld [vmem:[#allocation4 + $0x38] sm:$0xff]   ;;  %v287_v20 = vld [vmem:[%s513_s2] ss:$0 sm:$0xff] }
  0x2c   :  { %326 = vmatpush3.bf16.msra.mxu0 %v370_v2  ;;  %346 = vmatpush3.bf16.msra.mxu1 %v378_v6  ;;  %v296_v30 = vld [vmem:[%s515_s4] ss:$0 sm:$0xff] }
  0x2d   :  { %327 = vmatprep.subr.bf16.mxu0 %v437_v0  ;;  %347 = vmatprep.subr.bf16.mxu1 %v437_v0 }
  0x30   :  { %328 = vmatpush3.bf16.msra.mxu0 %v371_v3  ;;  %348 = vmatpush3.bf16.msra.mxu1 %v379_v8 }
  0x31   :  { %329 = vmatprep.subr.bf16.mxu0 %v437_v0  ;;  %349 = vmatprep.subr.bf16.mxu1 %v437_v0 }
  0x34   :  { %330 = vmatpush3.bf16.msra.mxu0 %v372_v5  ;;  %350 = vmatpush3.bf16.msra.mxu1 %v380_v10 }
  0x35   :  { %331 = vmatprep.subr.bf16.mxu0 %v437_v0  ;;  %351 = vmatprep.subr.bf16.mxu1 %v437_v0 }
  0x38   :  { %332 = vmatpush3.bf16.msra.mxu0 %v373_v7  ;;  %352 = vmatpush3.bf16.msra.mxu1 %v381_v12 }
  0x39   :  { %333 = vmatprep.subr.bf16.mxu0 %v437_v0  ;;  %353 = vmatprep.subr.bf16.mxu1 %v437_v0 }
  0x3c   :  { %334 = vmatpush3.bf16.msra.mxu0 %v374_v9  ;;  %354 = vmatpush3.bf16.msra.mxu1 %v382_v16 }
  0x3d   :  { %335 = vmatprep.subr.bf16.mxu0 %v437_v0  ;;  %355 = vmatprep.subr.bf16.mxu1 %v437_v0 }
  0x40   :  { %336 = vmatpush3.bf16.msra.mxu0 %v375_v11  ;;  %356 = vmatpush3.bf16.msra.mxu1 %v383_v18 }
  0x41   :  { %337 = vmatprep.subr.bf16.mxu0 %v437_v0  ;;  %357 = vmatprep.subr.bf16.mxu1 %v437_v0 }
  0x44   :  { %338 = vmatpush3.bf16.msra.mxu0 %v376_v13  ;;  %358 = vmatpush3.bf16.msra.mxu1 %v384_v19 }
  0x47   :  { %340 = vmatmul.mubr.bf16.vlgmr.msra.gmra.mrb[0].mxu0 %v51_v17 }
 0x11a   :  { %v157_v21 = vpop.f32.mrb[0].mxu0 }
 0x11b   :  { %v158_v22 = vadd.f32 %v287_v20, %v157_v21  ;;  %v341_v23 = vpop.f32.mrb[1].mxu0 }
 0x11c   :  { %v160_v24 = vpop.f32.mrb[2].mxu0 }
 0x11d   :  { %v161_v25 = vadd.f32 %v287_v20, %v160_v24  ;;  %v342_v26 = vpop.f32.mrb[3].mxu0  ;;  %v164_v27 = vmax.f32 %v158_v22, 0.0 }
 0x11f   :  { %v165_v28 = vmax.f32 %v161_v25, 0.0 }
 0x121   :  { %v166_v29 = vpack.c.bf16 %v165_v28, %v164_v27 }
 0x123   :  { %360 = vmatmul.mubr.bf16.vlgmr.msra.gmra.mrb[0].mxu1 %v166_v29 }
 0x1f6   :  { %v272_v31 = vpop.f32.mrb[0].mxu1 }
 0x1f7   :  { %v273_v32 = vadd.f32 %v296_v30, %v272_v31  ;;  %v361_v33 = vpop.f32.mrb[1].mxu1 }
 0x1f8   :  { %v275_v34 = vpop.f32.mrb[2].mxu1 }
 0x1f9   :  { %279 = vst [vmem:[%s516_s5] sm:$0xff] %v273_v32  ;;  %v276_v35 = vadd.f32 %v296_v30, %v275_v34  ;;  %v362_v36 = vpop.f32.mrb[3].mxu1 }
 0x1fb   :  { %280 = vst [vmem:[%s516_s5 + $0x8] sm:$0xff] %v276_v35 }
 0x1fc   :  { %285 = vsyncpa [#allocation3], 1 }
 0x1fd   :  { %286 = vsyncpa [#allocation5], 1 }

</bundles_post_ra>
